<compile_context>
chip_gen: v7x
topology: tpu7x:2x2x1
jax: 0.10.0
libtpu: 0.0.40
codegen_flags: <defaults>
</compile_context>

<pallas_src>
import jax
import jax.numpy as jnp
from jax.experimental import pallas as pl
from jax.experimental.pallas import tpu as pltpu


def make_positional_encoding(d_model: int, max_len: int = 5000,
                             dtype=jnp.float32) -> jnp.ndarray:
    """Deterministic sinusoidal buffer (same math as the PyTorch __init__).

    Built once at init in the model compute dtype so the per-call wrapper does
    not re-slice/re-cast the table.  NOTE: the PyTorch reference keeps pe in
    fp32, so for bf16 activations torch type-promotion would yield an fp32
    output; here the output keeps the activation dtype (standard practice).
    Pass dtype=jnp.float32 for exact parity with fp32 activations.
    """
    if d_model % 2 != 0:
        # The PyTorch reference itself requires even d_model (shape mismatch otherwise).
        raise ValueError(f"d_model must be even, got {d_model}")
    position = jnp.arange(0, max_len, dtype=jnp.float32)[:, None]            # (max_len, 1)
    div_term = jnp.exp(
        jnp.arange(0, d_model, 2, dtype=jnp.float32)
        * -(jnp.log(jnp.float32(10000.0)) / d_model)
    )                                                                        # (d_model//2,)
    pe = jnp.zeros((max_len, d_model), dtype=jnp.float32)
    pe = pe.at[:, 0::2].set(jnp.sin(position * div_term))
    pe = pe.at[:, 1::2].set(jnp.cos(position * div_term))
    return pe.astype(dtype)


def _pos_enc_kernel(x_ref, pe_ref, o_ref):
    # x_ref / o_ref: (tb, tsd) VMEM tiles.  pe_ref: (1, tsd) chunk, resident in
    # VMEM across all inner (batch) grid steps.  One lane-dense VPU add with a
    # broadcast over the sublane axis only.
    o_ref[...] = x_ref[...] + pe_ref[...]


def _tpu_generation():
    """Best-effort (scoped_vmem_budget_bytes, has_two_tensorcores). Never raises."""
    budget = 32 << 20          # default scoped VMEM on v6e / v7x
    two_cores = False
    try:
        kind = jax.devices()[0].device_kind.lower()
    except Exception:
        kind = ""
    if ("v5 lite" in kind) or ("v5e" in kind) or ("v5lite" in kind):
        budget = 16 << 20      # v5e default scoped VMEM
    if "7" in kind:            # v7x: 2 TensorCores/chip, only 64 MiB VMEM per core
        two_cores = True
    try:
        cap = getattr(pltpu.get_tpu_info(), "vmem_capacity_bytes", None)
        if cap:
            budget = min(budget, max(cap // 2, 8 << 20))
    except Exception:
        pass
    return budget, two_cores


def _choose_tiles(n_rows: int, row_len: int, itemsize: int,
                  tile_budget: int, two_cores: bool):
    """Pick (batch_tile, sd_tile) for the flattened (B, S*D) view."""
    sub = max(8, 32 // max(itemsize, 1))   # packed-sublane multiple: 8 f32 / 16 bf16 / 32 i8
    row_bytes = row_len * itemsize

    if row_bytes <= tile_budget:
        # Full lane-dense rows; tile over the batch axis only.
        tsd = row_len
        tb = max(1, tile_budget // row_bytes)
        if tb >= n_rows:
            tb = n_rows
        else:
            tb = min(n_rows, max(sub, (tb // sub) * sub))
    else:
        # Long sequence: minimal sublane rows, tile S*D in 128-lane multiples so
        # one tile never exceeds the budget (graceful on v7x's 64 MiB VMEM).
        tb = min(sub, n_rows)
        tsd = (tile_budget // max(tb * itemsize, 1)) // 128 * 128
        tsd = min(row_len, max(128, tsd))

    if two_cores and tsd == row_len:
        # v7x only: make sure both TensorCores get work / balanced step counts.
        steps = pl.cdiv(n_rows, tb)
        if steps == 1 and n_rows >= 2 * sub and n_rows * row_bytes >= (1 << 20):
            tb = min(n_rows, ((pl.cdiv(n_rows, 2) + sub - 1) // sub) * sub)
        elif steps > 1 and steps % 2 == 1 and n_rows > tb:
            cand = min(n_rows, max(sub, ((pl.cdiv(n_rows, steps + 1) + sub - 1) // sub) * sub))
            if pl.cdiv(n_rows, cand) % 2 == 0:
                tb = cand
    return tb, tsd


def positional_encoding(x: jnp.ndarray, pe: jnp.ndarray, *,
                        tile_bytes: int | None = None,
                        donate_x: bool = False) -> jnp.ndarray:
    """x: (B, S, D); pe: (max_len, D). Returns x + pe[:S] broadcast over batch."""
    B, S, D = x.shape
    max_len, d_model = pe.shape
    if S > max_len:
        raise ValueError(f"seq_len {S} exceeds positional-encoding max_len {max_len}")
    if D != d_model:
        raise ValueError(f"d_model mismatch: x has {D}, pe has {d_model}")

    SD = S * D
    x2 = x.reshape(B, SD)                       # free: row-major contiguous
    pe_row = pe[:S].reshape(1, SD)
    if pe_row.dtype != x.dtype:
        # No-op when pe was built in the model dtype at init (preferred path).
        pe_row = pe_row.astype(x.dtype)

    vmem_budget, two_cores = _tpu_generation()
    if tile_bytes is None:
        # <= ~6 live tile-equivalents (2x in + 2x out double buffers + pe) must
        # fit the scoped budget; //7 leaves headroom (and still fits if pe ends
        # up double-buffered on the fallback path).  Multi-MiB tiles sit on the
        # measured 85%+ HBM-roofline plateau on all generations.
        tile_bytes = min(6 << 20, max(512 << 10, vmem_budget // 7))

    itemsize = jnp.dtype(x.dtype).itemsize
    tb, tsd = _choose_tiles(B, SD, itemsize, tile_bytes, two_cores)
    grid = (pl.cdiv(SD, tsd), pl.cdiv(B, tb))   # S*D outer, batch inner

    x_spec = pl.BlockSpec((tb, tsd), lambda s, b: (b, s))
    out_spec = pl.BlockSpec((tb, tsd), lambda s, b: (b, s))
    pe_map = lambda s, b: (0, s)                # constant over inner axis -> stays resident

    def run(pe_spec):
        return pl.pallas_call(
            _pos_enc_kernel,
            out_shape=jax.ShapeDtypeStruct((B, SD), x.dtype),
            grid_spec=pltpu.PrefetchScalarGridSpec(
                num_scalar_prefetch=0,
                grid=grid,
                in_specs=[x_spec, pe_spec],
                out_specs=out_spec,
            ),
            compiler_params=pltpu.CompilerParams(
                dimension_semantics=("parallel", "parallel"),
                vmem_limit_bytes=vmem_budget,
            ),
            # x -> out aliasing avoids allocating a second B*S*D HBM buffer when
            # the caller donates x (jit(..., donate_argnums=...)); the input-0
            # and output block indices coincide at every grid step, so it's safe.
            input_output_aliases=({0: 0} if donate_x else {}),
        )(x2, pe_row)

    try:
        # pe is effectively constant: single-buffer it to halve its VMEM footprint.
        out = run(pl.BlockSpec((1, tsd), pe_map, pipeline_mode=pl.Buffered(1)))
    except Exception:
        out = run(pl.BlockSpec((1, tsd), pe_map))
    return out.reshape(B, S, D)


if __name__ == "__main__":
    # Shapes implied by the module's forward: (batch, seq_len, d_model).
    B, S, D = 2, 8, 32
    key = jax.random.PRNGKey(0)
    x = jax.random.normal(key, (B, S, D), dtype=jnp.float32)
    pe = make_positional_encoding(D, max_len=64, dtype=x.dtype)   # init-time buffer

    out = jax.block_until_ready(positional_encoding(x, pe))
    ref = x + pe[:S][None, :, :]
    assert out.shape == (B, S, D)
    assert jnp.allclose(out, ref, atol=1e-6, rtol=1e-6), "mismatch vs reference"

    # Batch-tiled path with a partial last batch block (tb=8, B=20 -> 3 steps).
    B2, S2, D2 = 20, 16, 128
    x2 = jax.random.normal(jax.random.PRNGKey(1), (B2, S2, D2), dtype=jnp.float32)
    pe2 = make_positional_encoding(D2, max_len=64, dtype=x2.dtype)
    out2 = jax.block_until_ready(positional_encoding(x2, pe2, tile_bytes=64 * 1024))
    ref2 = x2 + pe2[:S2][None, :, :]
    assert jnp.allclose(out2, ref2, atol=1e-6, rtol=1e-6), "mismatch (batch-tiled)"

    # Long-sequence path: row_bytes > tile_bytes -> S*D axis tiled in 128-lane
    # chunks (SD=10752 is not a multiple of the 1024 chunk -> partial last block).
    B3, S3, D3 = 4, 64, 168
    x3 = jax.random.normal(jax.random.PRNGKey(2), (B3, S3, D3), dtype=jnp.float32)
    pe3 = make_positional_encoding(D3, max_len=128, dtype=x3.dtype)
    out3 = jax.block_until_ready(positional_encoding(x3, pe3, tile_bytes=16 * 1024))
    ref3 = x3 + pe3[:S3][None, :, :]
    assert jnp.allclose(out3, ref3, atol=1e-6, rtol=1e-6), "mismatch (SD-tiled)"

    # bf16 path exercises the dtype-aware (16-row) packed-sublane rounding.
    B4, S4, D4 = 32, 16, 128
    x4 = jax.random.normal(jax.random.PRNGKey(3), (B4, S4, D4), dtype=jnp.bfloat16)
    pe4 = make_positional_encoding(D4, max_len=64, dtype=jnp.bfloat16)
    out4 = jax.block_until_ready(positional_encoding(x4, pe4, tile_bytes=64 * 1024))
    ref4 = x4 + pe4[:S4][None, :, :]
    assert jnp.allclose(out4.astype(jnp.float32), ref4.astype(jnp.float32),
                        atol=1e-2, rtol=1e-2), "mismatch (bf16)"

    print("KERNEL_OK")
</pallas_src>

<mosaic_0001>
module attributes {stable_mosaic.version = 11 : i64} {
  func.func @_pos_enc_kernel(%arg0: i32, %arg1: i32, %arg2: memref<2x256xf32, #tpu.memory_space<vmem>>, %arg3: memref<1x256xf32, #tpu.memory_space<vmem>>, %arg4: memref<2x256xf32, #tpu.memory_space<vmem>>) attributes {dimension_semantics = [#tpu.dimension_semantics<parallel>, #tpu.dimension_semantics<parallel>], iteration_bounds = array<i64: 1, 1>, scalar_prefetch = 0 : i64, scratch_operands = 0 : i64, tpu.core_type = #tpu.core_type<tc>, window_params = [{transform_indices = @transform_0, window_bounds = array<i64: 2, 256>}, {pipeline_mode = #tpu.pipeline_mode<synchronous>, transform_indices = @transform_1, window_bounds = array<i64: 1, 256>}, {transform_indices = @transform_2, window_bounds = array<i64: 2, 256>}]} {
    %c0 = arith.constant 0 : index
    %c0_0 = arith.constant 0 : index
    %0 = vector.load %arg2[%c0, %c0_0] : memref<2x256xf32, #tpu.memory_space<vmem>>, vector<2x256xf32>
    %c0_1 = arith.constant 0 : index
    %c0_2 = arith.constant 0 : index
    %1 = vector.load %arg3[%c0_1, %c0_2] : memref<1x256xf32, #tpu.memory_space<vmem>>, vector<1x256xf32>
    %2 = vector.broadcast %1 : vector<1x256xf32> to vector<2x256xf32>
    %3 = arith.addf %0, %2 : vector<2x256xf32>
    %c0_3 = arith.constant 0 : index
    %c0_4 = arith.constant 0 : index
    %4 = vector.load %arg4[%c0_3, %c0_4] : memref<2x256xf32, #tpu.memory_space<vmem>>, vector<2x256xf32>
    tpu.vector_store %arg4[%c0_3, %c0_4], %3 {strides = array<i32>} : memref<2x256xf32, #tpu.memory_space<vmem>>, vector<2x256xf32>,
    return
  }
  func.func @transform_0(%arg0: i32, %arg1: i32) -> (i32, i32) {
    %c0_i32 = arith.constant 0 : i32
    return %arg1, %arg0 : i32, i32
  }
  func.func @transform_1(%arg0: i32, %arg1: i32) -> (i32, i32) {
    %c0_i32 = arith.constant 0 : i32
    %c0_i32_0 = arith.constant 0 : i32
    return %c0_i32, %arg0 : i32, i32
  }
  func.func @transform_2(%arg0: i32, %arg1: i32) -> (i32, i32) {
    %c0_i32 = arith.constant 0 : i32
    return %arg1, %arg0 : i32, i32
  }
}

module attributes {stable_mosaic.version = 11 : i64} {
  func.func @_pos_enc_kernel(%arg0: i32, %arg1: i32, %arg2: memref<2x256xf32, #tpu.memory_space<vmem>>, %arg3: memref<1x256xf32, #tpu.memory_space<vmem>>, %arg4: memref<2x256xf32, #tpu.memory_space<vmem>>) attributes {dimension_semantics = [#tpu.dimension_semantics<parallel>, #tpu.dimension_semantics<parallel>], iteration_bounds = array<i64: 1, 1>, scalar_prefetch = 0 : i64, scratch_operands = 0 : i64, tpu.core_type = #tpu.core_type<tc>, window_params = [{transform_indices = @transform_0, window_bounds = array<i64: 2, 256>}, {transform_indices = @transform_1, window_bounds = array<i64: 1, 256>}, {transform_indices = @transform_2, window_bounds = array<i64: 2, 256>}]} {
    %c0 = arith.constant 0 : index
    %c0_0 = arith.constant 0 : index
    %0 = vector.load %arg2[%c0, %c0_0] : memref<2x256xf32, #tpu.memory_space<vmem>>, vector<2x256xf32>
    %c0_1 = arith.constant 0 : index
    %c0_2 = arith.constant 0 : index
    %1 = vector.load %arg3[%c0_1, %c0_2] : memref<1x256xf32, #tpu.memory_space<vmem>>, vector<1x256xf32>
    %2 = vector.broadcast %1 : vector<1x256xf32> to vector<2x256xf32>
    %3 = arith.addf %0, %2 : vector<2x256xf32>
    %c0_3 = arith.constant 0 : index
    %c0_4 = arith.constant 0 : index
    %4 = vector.load %arg4[%c0_3, %c0_4] : memref<2x256xf32, #tpu.memory_space<vmem>>, vector<2x256xf32>
    tpu.vector_store %arg4[%c0_3, %c0_4], %3 {strides = array<i32>} : memref<2x256xf32, #tpu.memory_space<vmem>>, vector<2x256xf32>,
    return
  }
  func.func @transform_0(%arg0: i32, %arg1: i32) -> (i32, i32) {
    %c0_i32 = arith.constant 0 : i32
    return %arg1, %arg0 : i32, i32
  }
  func.func @transform_1(%arg0: i32, %arg1: i32) -> (i32, i32) {
    %c0_i32 = arith.constant 0 : i32
    %c0_i32_0 = arith.constant 0 : i32
    return %c0_i32, %arg0 : i32, i32
  }
  func.func @transform_2(%arg0: i32, %arg1: i32) -> (i32, i32) {
    %c0_i32 = arith.constant 0 : i32
    return %arg1, %arg0 : i32, i32
  }
}

</mosaic_0001>

<bundles_post_ra>
// kernel: tpu_custom_call.1
= control target key start
LH: loop header
LB: loop body
LE: loop exit
PB: predicated region body
PF: predicated region fallthrough
CT: control target
= control target key end

     0   :  { %7 = vsyncpa [#allocation3], 0  ;;  %s157_s0 = inlined_call_operand.hbm [shape: f32[2,256], index: 0, kind: input, shape index: {}]   ;;  %s158_s1 = inlined_call_operand.vmem [shape: f32[1,256], index: 1, kind: input, shape index: {}]   ;;  %s159_s2 = inlined_call_operand.hbm [shape: f32[2,256], index: 2, kind: output, shape index: {}]  }
   0x1   :  { %8 = vsyncpa [#allocation4], 0  ;;  %s112_s9 = smov [#allocation2]   ;;  %s64_s13 = scalar_lea.hbm %s157_s0, 64 }
   0x2   :  { %s15_s10 = sshll.u32 %s112_s9, 4  ;;  %p65_p0 = scmp.ne.s32.totalorder %s157_s0, %s64_s13  ;;  %s16_s10 = int_to_ptr.vmem [resolvable:$true] %s15_s10 }
   0x3   :  { %p68_p1 = scmp.lt.u32.totalorder %s64_s13, %s157_s0 }
   0x5   :  { %p70_p2 = pnand %p68_p1, %p65_p0 }
   0x7   :  { %73 = shalt.err (!%p70_p2)
}
   0x8   :  { %s74_s18 = scalar_lea.vmem %s16_s10, 64  ;;  %p79_p4 = scmp.lt.s32.totalorder %s16_s10, %s16_s10 }
   0x9   :  { %p75_p3 = scmp.ne.s32.totalorder %s16_s10, %s74_s18  ;;  %p80_p5 = scmp.lt.s32.totalorder %s74_s18, %s74_s18 }
   0xb   :  { %p81_p6 = por %p80_p5, %p79_p4 }
   0xd   :  { %p82_p7 = pnand %p81_p6, %p75_p3 }
   0xf   :  { %85 = shalt.err (!%p82_p7)
}
  0x10   :  { %18 = dma.hbm_to_vmem [thread:$0]  %s157_s0, 64, %s16_s10, [#allocation3]  }
  0x11   :  { %108 = dma.done.wait [#allocation3], 64  }
  0x12   :  { %109 = vsyncadd [#allocation3], 4294967232  ;;  %v27_v0 = vlaneseq  ;;  %v113_v1 = vmov 1983009808   ;;  %v25_v7 = vld [vmem:[%s158_s1] sm:$0x3] }
  0x13   :  { %v37_v2 = vunpack.c.l.s4 %v113_v1  ;;  %v24_v12 = vld [vmem:[#allocation2] sm:$0xf]  ;;  %s114_s23 = smov [#allocation5]  }
  0x14   :  { %v28_v3 = vshrl.u32 %v27_v0, 7  ;;  %s52_s0 = sshll.u32 %s114_s23, 4  ;;  %s53_s0 = int_to_ptr.vmem [resolvable:$true] %s52_s0 }
  0x15   :  { %v38_v6 = vunpack.c.0.s8 %v37_v2  ;;  %s86_s24 = scalar_lea.vmem %s53_s0, 64  ;;  %p91_p9 = scmp.lt.s32.totalorder %s53_s0, %s53_s0 }
  0x16   :  { %v29_v4 = vsub.s32 0, %v28_v3  ;;  %v33_v5 = vsub.s32 1, %v28_v3  ;;  %p87_p8 = scmp.ne.s32.totalorder %s53_s0, %s86_s24  ;;  %p92_p10 = scmp.lt.s32.totalorder %s86_s24, %s86_s24 }
  0x17   :  { %v41_v10 = vsub.s32 %v38_v6, %v28_v3 }
  0x18   :  { %v30_v8 = vrot.slane %v25_v7, %v29_v4  ;;  %v34_v9 = vrot.slane %v25_v7, %v33_v5  ;;  %p93_p11 = por %p92_p10, %p91_p9 }
  0x1a   :  { %v35_v11 = vcombine.low %v30_v8, %v34_v9  ;;  %p94_p12 = pnand %p93_p11, %p87_p8 }
  0x1c   :  { %v42_v13 = vrot.slane %v35_v11, %v41_v10 }
  0x1e   :  { %v44_v14 = vadd.f32 %v42_v13, %v24_v12 }
  0x20   :  { %45 = vst [vmem:[#allocation5] sm:$0xf] %v44_v14 }
  0x21   :  { %97 = shalt.err (!%p94_p12)
}
  0x22   :  { %s98_s26 = scalar_lea.hbm %s159_s2, 64 }
  0x23   :  { %p99_p13 = scmp.ne.s32.totalorder %s159_s2, %s98_s26  ;;  %p102_p0 = scmp.lt.u32.totalorder %s98_s26, %s159_s2 }
  0x25   :  { %p104_p1 = pnand %p102_p0, %p99_p13 }
  0x27   :  { %107 = shalt.err (!%p104_p1)
}
  0x28   :  { %55 = dma.vmem_to_hbm [thread:$0]  %s53_s0, 64, %s159_s2, [#allocation4]  }
  0x29   :  { %110 = dma.done.wait [#allocation4], 64  }
  0x2a   :  { %111 = vsyncadd [#allocation4], 4294967232 }
  0x2b   :  { %59 = vsyncpa [#allocation3], 1 }
  0x2c   :  { %60 = vsyncpa [#allocation4], 1 }

// kernel: tpu_custom_call.1
= control target key start
LH: loop header
LB: loop body
LE: loop exit
PB: predicated region body
PF: predicated region fallthrough
CT: control target
= control target key end

     0   :  { %7 = vsyncpa [#allocation3], 0  ;;  %s157_s0 = inlined_call_operand.hbm [shape: f32[2,256], index: 0, kind: input, shape index: {}]   ;;  %s158_s1 = inlined_call_operand.vmem [shape: f32[1,256], index: 1, kind: input, shape index: {}]   ;;  %s159_s2 = inlined_call_operand.hbm [shape: f32[2,256], index: 2, kind: output, shape index: {}]  }
   0x1   :  { %8 = vsyncpa [#allocation4], 0  ;;  %s112_s9 = smov [#allocation2]   ;;  %s64_s13 = scalar_lea.hbm %s157_s0, 64 }
   0x2   :  { %s15_s10 = sshll.u32 %s112_s9, 4  ;;  %p65_p0 = scmp.ne.s32.totalorder %s157_s0, %s64_s13  ;;  %s16_s10 = int_to_ptr.vmem [resolvable:$true] %s15_s10 }
   0x3   :  { %p68_p1 = scmp.lt.u32.totalorder %s64_s13, %s157_s0 }
   0x5   :  { %p70_p2 = pnand %p68_p1, %p65_p0 }
   0x7   :  { %73 = shalt.err (!%p70_p2)
}
   0x8   :  { %s74_s18 = scalar_lea.vmem %s16_s10, 64  ;;  %p79_p4 = scmp.lt.s32.totalorder %s16_s10, %s16_s10 }
   0x9   :  { %p75_p3 = scmp.ne.s32.totalorder %s16_s10, %s74_s18  ;;  %p80_p5 = scmp.lt.s32.totalorder %s74_s18, %s74_s18 }
   0xb   :  { %p81_p6 = por %p80_p5, %p79_p4 }
   0xd   :  { %p82_p7 = pnand %p81_p6, %p75_p3 }
   0xf   :  { %85 = shalt.err (!%p82_p7)
}
  0x10   :  { %18 = dma.hbm_to_vmem [thread:$0]  %s157_s0, 64, %s16_s10, [#allocation3]  }
  0x11   :  { %108 = dma.done.wait [#allocation3], 64  }
  0x12   :  { %109 = vsyncadd [#allocation3], 4294967232  ;;  %v27_v0 = vlaneseq  ;;  %v113_v1 = vmov 1983009808   ;;  %v25_v7 = vld [vmem:[%s158_s1] sm:$0x3] }
  0x13   :  { %v37_v2 = vunpack.c.l.s4 %v113_v1  ;;  %v24_v12 = vld [vmem:[#allocation2] sm:$0xf]  ;;  %s114_s23 = smov [#allocation5]  }
  0x14   :  { %v28_v3 = vshrl.u32 %v27_v0, 7  ;;  %s52_s0 = sshll.u32 %s114_s23, 4  ;;  %s53_s0 = int_to_ptr.vmem [resolvable:$true] %s52_s0 }
  0x15   :  { %v38_v6 = vunpack.c.0.s8 %v37_v2  ;;  %s86_s24 = scalar_lea.vmem %s53_s0, 64  ;;  %p91_p9 = scmp.lt.s32.totalorder %s53_s0, %s53_s0 }
  0x16   :  { %v29_v4 = vsub.s32 0, %v28_v3  ;;  %v33_v5 = vsub.s32 1, %v28_v3  ;;  %p87_p8 = scmp.ne.s32.totalorder %s53_s0, %s86_s24  ;;  %p92_p10 = scmp.lt.s32.totalorder %s86_s24, %s86_s24 }
  0x17   :  { %v41_v10 = vsub.s32 %v38_v6, %v28_v3 }
  0x18   :  { %v30_v8 = vrot.slane %v25_v7, %v29_v4  ;;  %v34_v9 = vrot.slane %v25_v7, %v33_v5  ;;  %p93_p11 = por %p92_p10, %p91_p9 }
  0x1a   :  { %v35_v11 = vcombine.low %v30_v8, %v34_v9  ;;  %p94_p12 = pnand %p93_p11, %p87_p8 }
  0x1c   :  { %v42_v13 = vrot.slane %v35_v11, %v41_v10 }
  0x1e   :  { %v44_v14 = vadd.f32 %v42_v13, %v24_v12 }
  0x20   :  { %45 = vst [vmem:[#allocation5] sm:$0xf] %v44_v14 }
  0x21   :  { %97 = shalt.err (!%p94_p12)
}
  0x22   :  { %s98_s26 = scalar_lea.hbm %s159_s2, 64 }
  0x23   :  { %p99_p13 = scmp.ne.s32.totalorder %s159_s2, %s98_s26  ;;  %p102_p0 = scmp.lt.u32.totalorder %s98_s26, %s159_s2 }
  0x25   :  { %p104_p1 = pnand %p102_p0, %p99_p13 }
  0x27   :  { %107 = shalt.err (!%p104_p1)
}
  0x28   :  { %55 = dma.vmem_to_hbm [thread:$0]  %s53_s0, 64, %s159_s2, [#allocation4]  }
  0x29   :  { %110 = dma.done.wait [#allocation4], 64  }
  0x2a   :  { %111 = vsyncadd [#allocation4], 4294967232 }
  0x2b   :  { %59 = vsyncpa [#allocation3], 1 }
  0x2c   :  { %60 = vsyncpa [#allocation4], 1 }

</bundles_post_ra>
